<compile_context>
chip_gen: v7x
topology: tpu7x:2x2x1
jax: 0.10.0
libtpu: 0.0.40
codegen_flags: <defaults>
</compile_context>

<pallas_src>
import jax
import jax.numpy as jnp
from jax.experimental import pallas as pl
from jax.experimental.pallas import tpu as pltpu


def _conv1x1_kernel(x_ref, w_ref, o_ref):
    # x_ref: (1, Cin, T)  -- T spatial positions on the lane axis
    # w_ref: (Cout, Cin)
    # o_ref: (1, Cout, T)
    o_ref[0] = jnp.dot(
        w_ref[...], x_ref[0], preferred_element_type=jnp.float32
    ).astype(o_ref.dtype)


def _pick_spatial_tile(hw: int, max_tile: int = 4096) -> int:
    """Largest multiple of 128 that divides hw (capped), else the full extent."""
    if hw % 128 != 0:
        return hw  # full-extent block is always legal
    tile = min(hw, max_tile)
    tile -= tile % 128
    while hw % tile:
        tile -= 128
    return tile


def last_conv_block(x_nchw, w_oi11):
    """x_nchw: (N, Cin, H, W); w_oi11: PyTorch Conv2d weight (Cout, Cin, 1, 1)."""
    N, Cin, H, W = x_nchw.shape
    Cout = w_oi11.shape[0]
    HW = H * W
    tile = _pick_spatial_tile(HW)
    n_tiles = HW // tile

    w2 = w_oi11.reshape(Cout, Cin)
    x = x_nchw.reshape(N, Cin, HW)          # contiguous reshape: no data movement

    out = pl.pallas_call(
        _conv1x1_kernel,
        out_shape=jax.ShapeDtypeStruct((N, Cout, HW), x_nchw.dtype),
        grid=(N, n_tiles),
        in_specs=[
            pl.BlockSpec((1, Cin, tile), lambda n, t: (n, 0, t)),
            pl.BlockSpec((Cout, Cin), lambda n, t: (0, 0)),
        ],
        out_specs=pl.BlockSpec((1, Cout, tile), lambda n, t: (n, 0, t)),
        compiler_params=pltpu.CompilerParams(
            dimension_semantics=("parallel", "parallel")
        ),
    )(x, w2)

    return out.reshape(N, Cout, H, W)


def init_last_conv_params(key, in_channels, out_channels):
    # PyTorch Conv2d default init: kaiming-uniform-ish bound = 1/sqrt(fan_in)
    bound = 1.0 / jnp.sqrt(jnp.float32(in_channels))
    return {
        "w": jax.random.uniform(
            key, (out_channels, in_channels, 1, 1), jnp.float32, -bound, bound
        )
    }


if __name__ == "__main__":
    # LastConvBlock(in_channels=4, out_channels=2) on x: (2, 4, 16, 16)
    in_channels, out_channels = 4, 2
    N, H, W = 2, 16, 16

    key = jax.random.PRNGKey(0)
    k_p, k_x = jax.random.split(key)
    params = init_last_conv_params(k_p, in_channels, out_channels)
    x = jax.random.normal(k_x, (N, in_channels, H, W), jnp.float32)

    out = last_conv_block(x, params["w"])
    jax.block_until_ready(out)
    assert out.shape == (N, out_channels, H, W), out.shape

    # numerical sanity check against plain-JAX reference (loose tol: MXU
    # default-precision f32 paths may differ slightly from XLA's dot)
    ref = jnp.einsum("oi,nihw->nohw", params["w"].reshape(out_channels, in_channels), x)
    max_err = jnp.max(jnp.abs(out - ref))
    assert float(max_err) < 5e-2, float(max_err)

    print("KERNEL_OK")
</pallas_src>

<mosaic_0001>
module attributes {stable_mosaic.version = 11 : i64} {
  func.func @_conv1x1_kernel(%arg0: i32, %arg1: i32, %arg2: memref<1x4x256xf32, #tpu.memory_space<vmem>>, %arg3: memref<2x4xf32, #tpu.memory_space<vmem>>, %arg4: memref<1x2x256xf32, #tpu.memory_space<vmem>>) attributes {dimension_semantics = [#tpu.dimension_semantics<parallel>, #tpu.dimension_semantics<parallel>], iteration_bounds = array<i64: 2, 1>, scalar_prefetch = 0 : i64, scratch_operands = 0 : i64, tpu.core_type = #tpu.core_type<tc>, window_params = [{transform_indices = @transform_0, window_bounds = array<i64: 1, 4, 256>}, {pipeline_mode = #tpu.pipeline_mode<synchronous>, transform_indices = @transform_1, window_bounds = array<i64: 2, 4>}, {transform_indices = @transform_2, window_bounds = array<i64: 1, 2, 256>}]} {
    %c0 = arith.constant 0 : index
    %c0_0 = arith.constant 0 : index
    %0 = vector.load %arg3[%c0, %c0_0] : memref<2x4xf32, #tpu.memory_space<vmem>>, vector<2x4xf32>
    %c0_1 = arith.constant 0 : index
    %c0_2 = arith.constant 0 : index
    %c0_3 = arith.constant 0 : index
    %1 = vector.load %arg2[%c0_1, %c0_2, %c0_3] : memref<1x4x256xf32, #tpu.memory_space<vmem>>, vector<1x4x256xf32>
    %2 = vector.shape_cast %1 : vector<1x4x256xf32> to vector<4x256xf32>
    %cst = arith.constant dense<0.000000e+00> : vector<2x256xf32>
    %3 = tpu.matmul %0, %2, %cst {dimension_numbers = #tpu.dot_dimension_numbers<[1], [0], [0], [1], [0, 0, 1, 1], [], []>} : vector<2x4xf32>, vector<4x256xf32>, vector<2x256xf32> -> vector<2x256xf32>
    %c0_4 = arith.constant 0 : index
    %c0_5 = arith.constant 0 : index
    %c0_6 = arith.constant 0 : index
    %4 = vector.load %arg4[%c0_4, %c0_5, %c0_6] : memref<1x2x256xf32, #tpu.memory_space<vmem>>, vector<1x2x256xf32>
    %5 = vector.shape_cast %4 : vector<1x2x256xf32> to vector<2x256xf32>
    %6 = vector.shape_cast %3 : vector<2x256xf32> to vector<1x2x256xf32>
    tpu.vector_store %arg4[%c0_4, %c0_5, %c0_6], %6 {strides = array<i32>} : memref<1x2x256xf32, #tpu.memory_space<vmem>>, vector<1x2x256xf32>,
    return
  }
  func.func @transform_0(%arg0: i32, %arg1: i32) -> (i32, i32, i32) {
    %c0_i32 = arith.constant 0 : i32
    %c0_i32_0 = arith.constant 0 : i32
    return %arg0, %c0_i32, %arg1 : i32, i32, i32
  }
  func.func @transform_1(%arg0: i32, %arg1: i32) -> (i32, i32) {
    %c0_i32 = arith.constant 0 : i32
    %c0_i32_0 = arith.constant 0 : i32
    %c0_i32_1 = arith.constant 0 : i32
    return %c0_i32, %c0_i32_0 : i32, i32
  }
  func.func @transform_2(%arg0: i32, %arg1: i32) -> (i32, i32, i32) {
    %c0_i32 = arith.constant 0 : i32
    %c0_i32_0 = arith.constant 0 : i32
    return %arg0, %c0_i32, %arg1 : i32, i32, i32
  }
}

</mosaic_0001>

<bundles_post_ra>
// kernel: tpu_custom_call.1
= control target key start
LH: loop header
LB: loop body
LE: loop exit
PB: predicated region body
PF: predicated region fallthrough
CT: control target
= control target key end

     0   :  { %7 = vsyncpa [#allocation3], 0  ;;  %s770_s0 = inlined_call_operand.hbm [shape: f32[2,4,256], index: 0, kind: input, shape index: {}]   ;;  %s771_s1 = inlined_call_operand.vmem [shape: f32[2,4], index: 1, kind: input, shape index: {}]   ;;  %s772_s2 = inlined_call_operand.hbm [shape: f32[2,2,256], index: 2, kind: output, shape index: {}]  }
   0x1   :  { %9 = vsyncpa [#allocation3 + $0x1], 0 }
   0x2   :  { %10 = vsyncpa [#allocation4], 0 }
   0x3   :  { %12 = vsyncpa [#allocation4 + $0x1], 0  ;;  %s594_s9 = smov 0   ;;  %s596_s10 = smov 0  }
   0x4   :  { %s598_s11 = smov 0   ;;  %s600_s12 = smov 0  }
   0x5   :  { %s602_s13 = smov 0   ;;  %s604_s14 = smov 0  }
   0x6 LB: > { %s377_s15 = sadd.s32 4294967295, %s574_s14   ;;  %s378_s16 = sadd.s32 4294967294, %s574_s14   ;;  %s574_s14 = sphi %s604_s14, %s18_s14   ;;  %s570_s13 = sphi %s602_s13, %s788_s13   ;;  %s566_s12 = sphi %s600_s12, %s787_s12   ;;  %s562_s11 = sphi %s598_s11, %s786_s11   ;;  %s558_s10 = sphi %s596_s10, %s785_s10   ;;  %s554_s9 = sphi %s594_s9, %s784_s9  }
   0x7   : > { %s30_s17 = sadd.s32 1, %s570_s13  ;;  %s39_s18 = sadd.s32 1, %s562_s11 }
   0x8   : > { %p32_p0 = scmp.ge.s32.totalorder %s30_s17, 2  ;;  %p46_p1 = scmp.ne.s32.totalorder %s562_s11, %s558_s10 }
   0x9   : > { %p47_p2 = scmp.eq.s32.totalorder %s574_s14, 0  ;;  %p52_p3 = scmp.ne.s32.totalorder %s558_s10, %s554_s9 }
   0xa   : > { %s790_s17 = smov (%p32_p0, %s30_s17), 0  ;;  %p53_p5 = scmp.eq.s32.totalorder %s377_s15, 0 }
   0xb   : > { %p635_p4 = por %p47_p2, %p46_p1  ;;  %s34_s20 = ssub.s32 %s570_s13, %s790_s17 }
   0xc   : > { %p99_p6 = scmp.eq.s32.totalorder %s377_s15, 1  ;;  %p37_p7 = scmp.eq.s32.totalorder %s34_s20, 0 }
   0xd   : > { %p641_p8 = por %p53_p5, %p52_p3  ;;  %p105_p10 = scmp.eq.s32.totalorder %s378_s16, 1 }
   0xe   : > { %p645_p9 = por %p99_p6, %p46_p1  ;;  %p410_p13 = scmp.lt.s32.totalorder %s574_s14, 2 }
   0xf   : > { %s650_s23 = scalar_select %p37_p7, %s562_s11, %s39_s18  }
  0x10   : > { %s776_s22 = scalar_select %p645_p9, 1, 0 }
  0x11   : > { %p652_p11 = por %p105_p10, %p52_p3  ;;  %s128_s25 = sand.u32 1, %s562_s11  }
  0x12   : > { %s381_s26 = sshll.u32 %s128_s25, 3  ;;  %s396_s27 = sshll.u32 %s570_s13, 7 }
  0x13   : > { %s777_s24 = scalar_select %p652_p11, 1, 0 }
  0x14   : > { %s663_s30 = scalar_lea.hbm %s770_s0, %s396_s27  ;;  %s132_s3 = scalar_lea.vmem [#allocation2], %s381_s26 }
  0x15   : > { %s142_s4 = sshll.u32 %s132_s3, 4  ;;  %p669_p0 = pnand %p410_p13, %p635_p4  ;;  %s665_s4 = int_to_ptr.vmem [resolvable:$true] %s142_s4 }
  0x16   : > { %s129_s6 = scalar_lea.sflag [#allocation3], %s128_s25  ;;  %s462_s7 = scalar_lea.hbm %s663_s30, 128 }
  0x17   : > { %p463_p3 = scmp.ne.s32.totalorder %s663_s30, %s462_s7  ;;  %p464_p5 = pneg %p669_p0 }
  0x18   : > { %s467_s16 = scalar_lea.hbm %s770_s0, 256  ;;  %p468_p4 = scmp.lt.u32.totalorder %s663_s30, %s770_s0 }
  0x19   : > { %p465_p6 = pnand %p464_p5, %p463_p3  ;;  %p469_p10 = scmp.lt.u32.totalorder %s467_s16, %s462_s7 }
  0x1a   : > { %p471_p12 = scmp.lt.u32.totalorder %s462_s7, %s663_s30 }
  0x1b   : > { %p466_p7 = pneg %p465_p6  ;;  %p470_p13 = por %p469_p10, %p468_p4 }
  0x1d   : > { %p472_p1 = por %p471_p12, %p470_p13 }
  0x1f   : > { %p473_p2 = pnand %p472_p1, %p466_p7 }
  0x21   : > { %476 = shalt.err (!%p473_p2)
}
  0x22   : > { %s477_s20 = scalar_lea.vmem %s665_s4, 128  ;;  %s576_s25 = smov [#allocation2]  }
  0x23   : > { %p478_p3 = scmp.ne.s32.totalorder %s665_s4, %s477_s20  ;;  %s482_s26 = sshll.u32 %s576_s25, 4  ;;  %s483_s26 = int_to_ptr.vmem [resolvable:$false] %s482_s26 }
  0x24   : > { %s484_s27 = scalar_lea.vmem %s483_s26, 256  ;;  %p485_p9 = scmp.lt.s32.totalorder %s665_s4, %s483_s26 }
  0x25   : > { %p480_p6 = pnand %p478_p3, %p464_p5  ;;  %p486_p4 = scmp.lt.s32.totalorder %s484_s27, %s477_s20 }
  0x27   : > { %p481_p11 = pneg %p480_p6  ;;  %p487_p10 = por %p486_p4, %p485_p9 }
  0x29   : > { %p488_p12 = pnand %p487_p10, %p481_p11 }
  0x2b   : > { %491 = shalt.err (!%p488_p12)
}
  0x2c   : > { %405 = dma.hbm_to_vmem [thread:$0]  (!%p669_p0), %s663_s30, 128, %s665_s4, %s129_s6  }
  0x2d   : > { %p779_p1 = scmp.lt.s32.totalorder %s574_s14, 3  ;;  %p780_p2 = scmp.ge.s32.totalorder %s574_s14, 1 }
  0x2f   : > { %p148_p5 = pnand %p780_p2, %p779_p1 }
  0x30   : > { %s705_s28 = sand.u32 (!%p148_p5), 1, %s558_s10  }
  0x31   : > { %151 = sbr.rel (%p148_p5) target bundleno = 291 (0x123), region = 28  ;;  %s385_s29 = sshll.u32 (!%p148_p5), %s705_s28, 3 }
  0x32   : > { %s154_s3 = scalar_lea.sflag (!%p148_p5), [#allocation3], %s705_s28  ;;  %s157_s7 = scalar_lea.vmem (!%p148_p5), [#allocation2], %s385_s29 }
  0x38   : > { %545 = dma.done.wait (%p641_p8), %s154_s3, 128  }
  0x39   : > { %547 = vsyncadd (%p641_p8), %s154_s3, 4294967168  ;;  %v577_v0 = vmov 0.0   ;;  %v181_v1 = vld [vmem:[%s157_s7] sm:$0xff]  ;;  %vm188_vm0 = vcmask 1043456   ;;  %vm184_vm1 = vcmask 31744   ;;  %s386_s5 = sshll.u32 %s705_s28, 2 }
  0x3a   : > { %257 = vmatprep.mubr.f32.mxu0 %v577_v0  ;;  %v183_v2 = vcombine.high %v181_v1, %v181_v1  ;;  %v180_v3 = vld [vmem:[%s771_s1] sm:$0x3]  ;;  %s397_s21 = sshll.u32 %s566_s12, 6  ;;  %s177_s6 = scalar_lea.vmem [#allocation5], %s386_s5 }
  0x3b   : > { %s293_s8 = sshll.u32 %s177_s6, 4  ;;  %s721_s18 = scalar_lea.hbm %s772_s2, %s397_s21  ;;  %s723_s8 = int_to_ptr.vmem [resolvable:$true] %s293_s8 }
  0x3c   : > { %387 = vmatprep.subr.msk.mxu0 %vm188_vm0, %v183_v2  ;;  %s277_s19 = scalar_lea.sflag [#allocation4], %s705_s28  ;;  %s492_s20 = scalar_lea.vmem %s723_s8, 64 }
  0x3d   : > { %388 = vmatpush1.msk.msra.mxu0 %vm188_vm0, %v181_v1  ;;  %p493_p8 = scmp.ne.s32.totalorder %s723_s8, %s492_s20  ;;  %p781_p9 = scmp.ne.s32.totalorder %s776_s22, 0 }
  0x3e   : > { %389 = vmatmul.mubr.msk.f32.vlgmr.msra.gmra.mrb[0].mxu0 %vm184_vm1, %v180_v3  ;;  %s578_s12 = smov [#allocation5]  }
  0x3f   : > { %p494_p11 = pnand %p493_p8, %p781_p9  ;;  %s496_s25 = sshll.u32 %s578_s12, 4  ;;  %s497_s25 = int_to_ptr.vmem [resolvable:$false] %s496_s25 }
  0x40   : > { %s498_s26 = scalar_lea.vmem %s497_s25, 128  ;;  %p499_p7 = scmp.lt.s32.totalorder %s723_s8, %s497_s25 }
  0x41   : > { %p495_p0 = pneg %p494_p11  ;;  %p500_p13 = scmp.lt.s32.totalorder %s498_s26, %s492_s20 }
  0x43   : > { %p501_p3 = por %p500_p13, %p499_p7 }
  0x45   : > { %p502_p6 = pnand %p501_p3, %p495_p0 }
 0x111   : > { %v259_v4 = vpop.f32.mrb[0].mxu0 }
 0x112   : > { %v261_v5 = vpop.f32.mrb[1].mxu0 }
 0x113   : > { %v266_v6 = vcombine.low %v259_v4, %v261_v5 }
 0x115   : > { %390 = vst.sshfl [vmem:[%s177_s6] sm:$0x33 pattern:$0x76325410] %v266_v6 }
 0x116   : > { %505 = shalt.err (!%p502_p6)
}
 0x117   : > { %s506_s27 = scalar_lea.hbm %s721_s18, 64  ;;  %s510_s3 = scalar_lea.hbm %s772_s2, 128 }
 0x118   : > { %p507_p4 = scmp.ne.s32.totalorder %s721_s18, %s506_s27  ;;  %p511_p1 = scmp.lt.u32.totalorder %s721_s18, %s772_s2 }
 0x119   : > { %p512_p2 = scmp.lt.u32.totalorder %s510_s3, %s506_s27  ;;  %p514_p8 = scmp.lt.u32.totalorder %s506_s27, %s721_s18 }
 0x11a   : > { %p508_p10 = pnand %p507_p4, %p781_p9 }
 0x11b   : > { %p513_p5 = por %p512_p2, %p511_p1 }
 0x11c   : > { %p509_p12 = pneg %p508_p10 }
 0x11d   : > { %p515_p11 = por %p514_p8, %p513_p5 }
 0x11f   : > { %p516_p0 = pnand %p515_p11, %p509_p12 }
 0x121   : > { %519 = shalt.err (!%p516_p0)
}
 0x122   : > { %400 = dma.vmem_to_hbm [thread:$0]  (%p781_p9), %s723_s8, 64, %s721_s18, %s277_s19  }
 0x123 PF: > { %s305_s4 = sand.u32 1, %s554_s9   ;;  %p782_p7 = scmp.ne.s32.totalorder %s777_s24, 0 }
 0x124   : > { %p783_p13 = scmp.ge.s32.totalorder %s574_s14, 2  ;;  %s306_s5 = scalar_lea.sflag [#allocation4], %s305_s4 }
 0x126   : > { %p407_p3 = pnand %p783_p13, %p782_p7 }
 0x128   : > { %549 = dma.done.wait (!%p407_p3), %s306_s5, 64  }
 0x129   : > { %551 = vsyncadd (!%p407_p3), %s306_s5, 4294967232  ;;  %s18_s14 = sadd.s32 1, %s574_s14   ;;  %s784_s9 = smov %s558_s10 }
 0x12a   : > { %p15_p6 = scmp.ge.s32.totalorder %s18_s14, 4   ;;  %s785_s10 = smov %s562_s11 }
 0x12b   : > { %s786_s11 = smov %s650_s23  ;;  %s787_s12 = smov %s570_s13 }
 0x12c   : > { %s788_s13 = smov %s790_s17  ;;  %17 = sbr.rel (!%p15_p6) target bundleno = 6 (0x6), region = 73 }
 0x133   :  { %311 = vsyncpa [#allocation3], 1 }
 0x134   :  { %313 = vsyncpa [#allocation3 + $0x1], 1 }
 0x135   :  { %314 = vsyncpa [#allocation4], 1 }
 0x136   :  { %316 = vsyncpa [#allocation4 + $0x1], 1 }

</bundles_post_ra>
